<compile_context>
chip_gen: v6e
topology: v6e:2x2x1
jax: 0.10.0
libtpu: 0.0.40
codegen_flags: <defaults>
</compile_context>

<pallas_src>
import math
import numpy as np
import jax
import jax.numpy as jnp
from jax.experimental import pallas as pl
from jax.experimental.pallas import tpu as pltpu

_EPS = 1e-5
_VMEM = pl.BlockSpec(memory_space=pltpu.MemorySpace.VMEM)

# Transposed conv (k=4, s=2, p=1): out[oy] += X[iy] * W[ky] whenever oy + 1 = 2*iy + ky.
# Per output-row parity ry, the contributing (input shift, kernel tap) pairs are:
_TAPS = {0: ((0, 1), (-1, 3)),    # even rows oy=2a : iy=a   (ky=1), iy=a-1 (ky=3)
         1: ((1, 0), (0, 2))}     # odd  rows oy=2a+1: iy=a+1 (ky=0), iy=a   (ky=2)


def _vmem_limit_bytes():
    # 3/4 of physical VMEM, capped at 96 MiB: ~96 MiB on v5e/v6e (128 MiB parts),
    # ~48 MiB on v7x (64 MiB part).  Conservative fallback if the query fails.
    try:
        cap = int(pltpu.get_tpu_info().vmem_capacity_bytes)
    except Exception:
        cap = 64 * 1024 * 1024
    return int(min(96 * 1024 * 1024, max(32 * 1024 * 1024, (cap * 3) // 4)))


# --------------------------------------------------------------------------
# initial layer: ConvTranspose2d(nz, C, 4, stride=1, pad=0) + BN + ReLU, fully fused
# --------------------------------------------------------------------------
def _initial_kernel(C, n):
    inv_n = 1.0 / n

    def kernel(x_ref, w_ref, g_ref, b_ref, o_ref):
        # (B, nz) @ (nz, 16*C) -> (B, 16*C); BN stats + scale/shift + ReLU while the
        # matmul result is still in VMEM (single HBM write of the activation).
        v = jnp.dot(x_ref[...], w_ref[...], preferred_element_type=jnp.float32)
        srow = jnp.sum(v, axis=0, keepdims=True)              # (1, 16*C)
        sqrow = jnp.sum(v * v, axis=0, keepdims=True)
        tot = jnp.zeros((1, C), jnp.float32)
        sq = jnp.zeros((1, C), jnp.float32)
        for k in range(16):                                   # fold the 16 spatial taps
            tot = tot + srow[:, k * C:(k + 1) * C]
            sq = sq + sqrow[:, k * C:(k + 1) * C]
        mean = tot * inv_n
        var = jnp.maximum(sq * inv_n - mean * mean, 0.0)      # clamp: cancellation safety
        inv = jax.lax.rsqrt(var + _EPS)
        scale = g_ref[...] * inv
        shift = b_ref[...] - mean * scale
        scale_t = jnp.concatenate([scale] * 16, axis=-1)      # (1, 16*C): matches v layout
        shift_t = jnp.concatenate([shift] * 16, axis=-1)
        o_ref[...] = jnp.maximum(v * scale_t + shift_t, 0.0).astype(o_ref.dtype)

    return kernel


def initial_convt_bn_relu(z, w0_packed, gamma, beta):
    # z: (B, nz) compute dtype;  w0_packed: (nz, 16*C) with column = (ky*4+kx)*C + c
    B, _nz = z.shape
    C = gamma.shape[-1]
    dt = z.dtype
    out = pl.pallas_call(
        _initial_kernel(C, float(16 * B)),
        out_shape=jax.ShapeDtypeStruct((B, 16 * C), dt),
        in_specs=[_VMEM, _VMEM, _VMEM, _VMEM],
        out_specs=_VMEM,
        compiler_params=pltpu.CompilerParams(vmem_limit_bytes=_vmem_limit_bytes()),
    )(z, w0_packed, gamma, beta)
    return out.reshape(B, 4, 4, C)                            # NHWC, spatial = (ky, kx)


# --------------------------------------------------------------------------
# pyramid / final layer: ConvTranspose2d(Cin, Cout, 4, stride=2, pad=1)
#   kernel A: sub-pixel conv; 4 accumulated matmuls per output parity, multi-image
#             packing along M, per-block partial BN stats
#   kernel B: BN-apply (precomputed scale/shift) + ReLU, elementwise, gridded
# --------------------------------------------------------------------------
def _convt_s2_kernel(H, W, Cout, bb, PI, with_stats):
    M = H * (W + 2)                 # valid rows per image in the flat working layout
    L = (bb - 1) * PI + M           # rows actually computed per grid block
    CL = 4 * Cout
    direct = (Cout % 128 == 0)      # lane-aligned per-parity stores

    def kernel(*refs):
        if with_stats:
            x_ref, w_ref, y_ref, st_ref = refs
        else:
            x_ref, w_ref, y_ref = refs

        # the 9 distinct shifted views, sliced once and reused across the 4 parities
        views = {}

        def view(sy, sx):
            key = (sy, sx)
            if key not in views:
                s0 = (1 + sy) * (W + 2) + (1 + sx)
                views[key] = x_ref[0, s0:s0 + L, :]            # (L, Cin)
            return views[key]

        if with_stats:
            ridx = jax.lax.broadcasted_iota(jnp.int32, (L, 1), 0)
            rloc = ridx % PI                                   # row within its image slab
            valid = ((rloc < M) & ((rloc % (W + 2)) < W)).astype(jnp.float32)
            tot = jnp.zeros((1, Cout), jnp.float32)
            sq = jnp.zeros((1, Cout), jnp.float32)

        vals = []
        p = 0
        for ry in (0, 1):
            for rx in (0, 1):
                acc = None
                t = 0
                for (sy, _ky) in _TAPS[ry]:
                    for (sx, _kx) in _TAPS[rx]:
                        part = jnp.dot(view(sy, sx), w_ref[4 * p + t],
                                       preferred_element_type=jnp.float32)
                        acc = part if acc is None else acc + part
                        t += 1
                if with_stats:
                    tot = tot + jnp.sum(acc * valid, axis=0, keepdims=True)
                    sq = sq + jnp.sum(acc * acc * valid, axis=0, keepdims=True)
                if direct:
                    y_ref[0, 0:L, p * Cout:(p + 1) * Cout] = acc.astype(y_ref.dtype)
                else:
                    vals.append(acc)
                p += 1

        if not direct:
            # TODO(synk): for tiny Cout (final layer, nc=3) the output stays lane-sparse;
            # a transposed (spatial-on-lanes) store would make it lane-dense.
            y_ref[0, 0:L, :] = jnp.concatenate(vals, axis=-1).astype(y_ref.dtype)
        # deterministic tail (the last image's halo rows are never computed)
        y_ref[0, L:bb * PI, :] = jnp.zeros((bb * PI - L, CL), y_ref.dtype)
        if with_stats:
            st_ref[0] = jnp.concatenate([tot, sq], axis=0)     # (2, Cout)

    return kernel


def _choose_block_images(B, PI, Cin, Cout, itemsize):
    # images packed per grid step: enough rows (~512) to feed the MXU, bounded by a
    # VMEM budget for the (double-buffered) IO blocks, keeping >= 2 grid steps for v7x.
    per_img = 2 * PI * (Cin + 4 * Cout) * itemsize
    bb = max(1, min((12 * 1024 * 1024) // per_img, -(-512 // PI)))
    if B >= 2:
        bb = min(bb, B // 2)
    bb = max(1, min(bb, B))
    while B % bb:
        bb -= 1
    return bb


def convt_s2(x_nhwc, wstack, *, with_stats):
    # x: (B, H, W, Cin) NHWC;  wstack: (16, Cin, Cout) pre-packed per (parity, tap)
    # returns y_block (B//bb, bb*PI, 4*Cout) packed-parity layout [+ stats (B//bb, 2, Cout)]
    B, H, W, Cin = x_nhwc.shape
    Cout = wstack.shape[-1]
    dt = x_nhwc.dtype
    itemsize = jnp.dtype(dt).itemsize
    M = H * (W + 2)
    PI = (H + 2) * (W + 2) + 2
    bb = _choose_block_images(B, PI, Cin, Cout, itemsize)
    nblk = B // bb
    L = (bb - 1) * PI + M

    # zero-pad once, flatten spatial dims, +2 tail rows so the largest shift stays in-slab,
    # then pack `bb` images per grid block along the row (matmul M) axis.
    xp = jnp.pad(x_nhwc, ((0, 0), (1, 1), (1, 1), (0, 0)))
    xpf = jnp.pad(xp.reshape(B, (H + 2) * (W + 2), Cin), ((0, 0), (0, 2), (0, 0)))
    x_block = xpf.reshape(nblk, bb * PI, Cin)

    out_shape = [jax.ShapeDtypeStruct((nblk, bb * PI, 4 * Cout), dt)]
    out_specs = [pl.BlockSpec((1, bb * PI, 4 * Cout), lambda b: (b, 0, 0))]
    if with_stats:
        out_shape.append(jax.ShapeDtypeStruct((nblk, 2, Cout), jnp.float32))
        out_specs.append(pl.BlockSpec((1, 2, Cout), lambda b: (b, 0, 0)))

    cost = pl.CostEstimate(
        flops=int(2 * nblk * 16 * L * Cin * Cout),
        transcendentals=0,
        bytes_accessed=int(nblk * bb * PI * (Cin + 4 * Cout) * itemsize
                           + 16 * Cin * Cout * itemsize))

    res = pl.pallas_call(
        _convt_s2_kernel(H, W, Cout, bb, PI, with_stats),
        grid=(nblk,),
        in_specs=[pl.BlockSpec((1, bb * PI, Cin), lambda b: (b, 0, 0)),
                  # constant index_map -> weight slab stays resident in VMEM.
                  # TODO(synk): on v7x add pipeline_mode=pl.Buffered(1) to drop the 2nd buffer.
                  pl.BlockSpec((16, Cin, Cout), lambda b: (0, 0, 0))],
        out_specs=tuple(out_specs) if with_stats else out_specs[0],
        out_shape=tuple(out_shape) if with_stats else out_shape[0],
        compiler_params=pltpu.CompilerParams(
            dimension_semantics=("parallel",),
            vmem_limit_bytes=_vmem_limit_bytes()),
        cost_estimate=cost,
    )(x_block, wstack)
    return res


def _bn_relu_kernel(x_ref, s_ref, t_ref, o_ref):
    # pure FMA + ReLU; scale/shift precomputed in the wrapper (already parity-tiled)
    x = x_ref[...].astype(jnp.float32)
    o_ref[...] = jnp.maximum(x * s_ref[...] + t_ref[...], 0.0).astype(o_ref.dtype)


def bn_relu_packed(y_block, scale_t, shift_t):
    # y_block: (nblk, R, CL); scale/shift: (1, CL) f32 (tiled over the 4 parities)
    nblk, R, CL = y_block.shape
    return pl.pallas_call(
        _bn_relu_kernel,
        grid=(nblk,),
        in_specs=[pl.BlockSpec((1, R, CL), lambda b: (b, 0, 0)),
                  pl.BlockSpec((1, CL), lambda b: (0, 0)),
                  pl.BlockSpec((1, CL), lambda b: (0, 0))],
        out_specs=pl.BlockSpec((1, R, CL), lambda b: (b, 0, 0)),
        out_shape=jax.ShapeDtypeStruct((nblk, R, CL), y_block.dtype),
        compiler_params=pltpu.CompilerParams(
            dimension_semantics=("parallel",),
            vmem_limit_bytes=_vmem_limit_bytes()),
    )(y_block, scale_t, shift_t)


def _deinterleave(y_flat, B, H, W, Cout):
    # (B, H*(W+2), 4*Cout) -> NHWC (B, 2H, 2W, Cout); drops the 2 junk cols per row.
    y = y_flat.reshape(B, H, W + 2, 2, 2, Cout)[:, :, :W]
    y = jnp.transpose(y, (0, 1, 3, 2, 4, 5))                   # (B, H, 2, W, 2, C)
    return y.reshape(B, 2 * H, 2 * W, Cout)


def pyramid_layer(h_nhwc, wstack, gamma, beta):
    B, H, W, _Cin = h_nhwc.shape
    Cout = wstack.shape[-1]
    M, PI = H * (W + 2), (H + 2) * (W + 2) + 2
    y_block, stats = convt_s2(h_nhwc, wstack, with_stats=True)

    # tiny (nblk, 2, Cout) reduction + scale/shift precompute in plain XLA (negligible)
    n = float(B * 4 * H * W)
    tot = jnp.sum(stats[:, 0, :], axis=0)
    sq = jnp.sum(stats[:, 1, :], axis=0)
    mean = tot / n
    var = jnp.maximum(sq / n - mean * mean, 0.0)               # clamp: cancellation safety
    scale = gamma.reshape(-1) * jax.lax.rsqrt(var + _EPS)
    shift = beta.reshape(-1) - mean * scale
    scale_t = jnp.tile(scale, 4).reshape(1, 4 * Cout).astype(jnp.float32)
    shift_t = jnp.tile(shift, 4).reshape(1, 4 * Cout).astype(jnp.float32)

    y_act = bn_relu_packed(y_block, scale_t, shift_t)
    y_flat = y_act.reshape(B, PI, 4 * Cout)[:, :M]
    # TODO(synk): the deinterleave transpose + next-layer halo pad still round-trip HBM via
    # XLA; fusing them into the Pallas passes is the remaining memory-traffic win.
    return _deinterleave(y_flat, B, H, W, Cout)


def final_layer(h_nhwc, wstack):
    B, H, W, _Cin = h_nhwc.shape
    Cout = wstack.shape[-1]
    M, PI = H * (W + 2), (H + 2) * (W + 2) + 2
    y_block = convt_s2(h_nhwc, wstack, with_stats=False)
    y_flat = y_block.reshape(B, PI, 4 * Cout)[:, :M]
    return _deinterleave(y_flat, B, H, W, Cout)


# --------------------------------------------------------------------------
# DCGAN_G parameters, one-time packing, forward
# --------------------------------------------------------------------------
def dcgan_g_init(key, isize, nz, nc, ngf):
    assert isize % 16 == 0, 'isize has to be a multiple of 16'
    cngf, tisize = ngf // 2, 4
    while tisize != isize:
        cngf, tisize = cngf * 2, tisize * 2

    keys = iter(jax.random.split(key, 64))
    nrm = lambda k, shape, std: std * jax.random.normal(k, shape, dtype=jnp.float32)

    params = {
        'w0': nrm(next(keys), (nz, cngf, 4, 4), 1.0 / math.sqrt(nz)),
        'g0': 1.0 + 0.1 * nrm(next(keys), (cngf,), 1.0),
        'b0': 0.1 * nrm(next(keys), (cngf,), 1.0),
        'pyramid': [],
    }
    csize, c = 4, cngf
    while csize < isize // 2:
        w = nrm(next(keys), (c, c // 2, 4, 4), 1.0 / math.sqrt(4 * c))
        g = 1.0 + 0.1 * nrm(next(keys), (c // 2,), 1.0)
        b = 0.1 * nrm(next(keys), (c // 2,), 1.0)
        params['pyramid'].append((w, g, b))
        c //= 2
        csize *= 2
    params['wf'] = nrm(next(keys), (c, nc, 4, 4), 1.0 / math.sqrt(4 * c))
    return params


def _pack_convt_weight(w_torch, dt):
    # (Cin, Cout, 4, 4) -> (16, Cin, Cout) stacked per (output parity, tap), matching the
    # kernel's accumulation order.
    wk = jnp.transpose(w_torch, (2, 3, 0, 1)).astype(dt)       # (ky, kx, Cin, Cout)
    parts = []
    for ry in (0, 1):
        for rx in (0, 1):
            for (_sy, ky) in _TAPS[ry]:
                for (_sx, kx) in _TAPS[rx]:
                    parts.append(wk[ky, kx])
    return jnp.stack(parts, axis=0)


def dcgan_g_pack_params(params, compute_dtype=jnp.float32):
    # All weight repacking hoisted out of the forward path (do this once, cache/jit it).
    nz, C = params['w0'].shape[:2]
    w0 = jnp.transpose(params['w0'], (0, 2, 3, 1)).reshape(nz, 16 * C).astype(compute_dtype)
    return {
        'dtype': compute_dtype,
        'w0': w0,
        'g0': params['g0'].reshape(1, -1).astype(jnp.float32),
        'b0': params['b0'].reshape(1, -1).astype(jnp.float32),
        'pyramid': [(_pack_convt_weight(w, compute_dtype),
                     g.reshape(1, -1).astype(jnp.float32),
                     b.reshape(1, -1).astype(jnp.float32))
                    for (w, g, b) in params['pyramid']],
        'wf': _pack_convt_weight(params['wf'], compute_dtype),
    }


def dcgan_g_forward(x_nchw, packed, in_vae=True):
    # x_nchw: (B, nz, 1, 1) -- same as the PyTorch module's input
    B, nz = x_nchw.shape[0], x_nchw.shape[1]
    z = x_nchw.reshape(B, nz).astype(packed['dtype'])
    h = initial_convt_bn_relu(z, packed['w0'], packed['g0'], packed['b0'])   # (B,4,4,C)
    for (wst, g, b) in packed['pyramid']:
        h = pyramid_layer(h, wst, g, b)                                      # conv+BN+ReLU
    h = final_layer(h, packed['wf'])                                         # conv only
    out = jnp.transpose(h, (0, 3, 1, 2)).astype(jnp.float32)                 # NCHW
    fill = math.log(1.0) if in_vae else math.log(0.1)
    out = jnp.concatenate([out, jnp.full_like(out, fill)], axis=1)
    # TODO(synk): `distributions.NormalDecoder` (undefined helper in the source) has no
    # Pallas equivalent; we return its parameter tensor (mean || log-scale fill).
    return out


# --------------------------------------------------------------------------
# pure-numpy reference (independent of the kernel math) for verification
# --------------------------------------------------------------------------
def _np_convt(x, w, stride, pad):
    B, Cin, H, W = x.shape
    Cout, K = w.shape[1], w.shape[2]
    Ho = (H - 1) * stride - 2 * pad + K
    Wo = (W - 1) * stride - 2 * pad + K
    out = np.zeros((B, Cout, Ho, Wo), np.float64)
    for iy in range(H):
        for ix in range(W):
            for ky in range(K):
                for kx in range(K):
                    oy = iy * stride - pad + ky
                    ox = ix * stride - pad + kx
                    if 0 <= oy < Ho and 0 <= ox < Wo:
                        out[:, :, oy, ox] += x[:, :, iy, ix] @ w[:, :, ky, kx]
    return out


def _np_bn_relu(x, g, b):
    mean = x.mean(axis=(0, 2, 3), keepdims=True)
    var = x.var(axis=(0, 2, 3), keepdims=True)            # biased, like torch training BN
    y = (x - mean) / np.sqrt(var + _EPS) * g.reshape(1, -1, 1, 1) + b.reshape(1, -1, 1, 1)
    return np.maximum(y, 0.0)


def reference_forward(x, params, in_vae=True):
    f64 = lambda a: np.asarray(a, np.float64)
    h = _np_convt(f64(x), f64(params['w0']), 1, 0)
    h = _np_bn_relu(h, f64(params['g0']), f64(params['b0']))
    for (w, g, b) in params['pyramid']:
        h = _np_convt(h, f64(w), 2, 1)
        h = _np_bn_relu(h, f64(g), f64(b))
    h = _np_convt(h, f64(params['wf']), 2, 1)
    fill = math.log(1.0) if in_vae else math.log(0.1)
    return np.concatenate([h, np.full_like(h, fill)], axis=1)


def _check(isize, nz, nc, ngf, B, seed, tol):
    key = jax.random.PRNGKey(seed)
    k_params, k_x = jax.random.split(key)
    params = dcgan_g_init(k_params, isize, nz, nc, ngf)
    x = jax.random.normal(k_x, (B, nz, 1, 1), dtype=jnp.float32)
    packed = dcgan_g_pack_params(params, jnp.float32)
    out = jax.block_until_ready(dcgan_g_forward(x, packed, in_vae=True))
    assert out.shape == (B, 2 * nc, isize, isize), out.shape
    ref = reference_forward(np.asarray(x), params, in_vae=True)
    np.testing.assert_allclose(np.asarray(out), ref, rtol=tol, atol=tol)
    return params, x


if __name__ == "__main__":
    # config 1 (PRNGKey(0)): tiny channels, batch 2 -> bb=1, tiny-Cout concat-store path
    params, x = _check(isize=16, nz=8, nc=3, ngf=8, B=2, seed=0, tol=2e-3)

    # config 2: Cout=128 pyramid (lane-aligned direct stores) + batch 8 (multi-image packing)
    _check(isize=16, nz=8, nc=3, ngf=128, B=8, seed=1, tol=3e-3)

    # bf16 path (same kernels; halves HBM/VMEM traffic, f32 MXU accumulation): smoke test
    packed_bf16 = dcgan_g_pack_params(params, jnp.bfloat16)
    out_bf16 = jax.block_until_ready(dcgan_g_forward(x, packed_bf16, in_vae=True))
    assert out_bf16.shape == (2, 2 * 3, 16, 16)
    assert bool(jnp.all(jnp.isfinite(out_bf16)))

    print("KERNEL_OK")
</pallas_src>

<mosaic_0001>
module attributes {stable_mosaic.version = 11 : i64} {
  func.func @kernel(%arg0: memref<2x8xf32, #tpu.memory_space<vmem>>, %arg1: memref<8x256xf32, #tpu.memory_space<vmem>>, %arg2: memref<1x16xf32, #tpu.memory_space<vmem>>, %arg3: memref<1x16xf32, #tpu.memory_space<vmem>>, %arg4: memref<2x256xf32, #tpu.memory_space<vmem>>) attributes {dimension_semantics = [], scalar_prefetch = 0 : i64, scratch_operands = 0 : i64, tpu.core_type = #tpu.core_type<tc>} {
    %c0 = arith.constant 0 : index
    %c0_0 = arith.constant 0 : index
    %0 = vector.load %arg0[%c0, %c0_0] : memref<2x8xf32, #tpu.memory_space<vmem>>, vector<2x8xf32>
    %c0_1 = arith.constant 0 : index
    %c0_2 = arith.constant 0 : index
    %1 = vector.load %arg1[%c0_1, %c0_2] : memref<8x256xf32, #tpu.memory_space<vmem>>, vector<8x256xf32>
    %cst = arith.constant dense<0.000000e+00> : vector<2x256xf32>
    %2 = tpu.matmul %0, %1, %cst {dimension_numbers = #tpu.dot_dimension_numbers<[1], [0], [0], [1], [0, 0, 1, 1], [], []>} : vector<2x8xf32>, vector<8x256xf32>, vector<2x256xf32> -> vector<2x256xf32>
    %cst_3 = arith.constant dense<0.000000e+00> : vector<256xf32>
    %3 = vector.multi_reduction <add>, %2, %cst_3 [0] : vector<2x256xf32> to vector<256xf32>
    %4 = vector.shape_cast %3 : vector<256xf32> to vector<1x256xf32>
    %5 = arith.mulf %2, %2 : vector<2x256xf32>
    %cst_4 = arith.constant dense<0.000000e+00> : vector<256xf32>
    %6 = vector.multi_reduction <add>, %5, %cst_4 [0] : vector<2x256xf32> to vector<256xf32>
    %7 = vector.shape_cast %6 : vector<256xf32> to vector<1x256xf32>
    %cst_5 = arith.constant 0.000000e+00 : f32
    %8 = vector.broadcast %cst_5 : f32 to vector<1x16xf32>
    %cst_6 = arith.constant 0.000000e+00 : f32
    %9 = vector.broadcast %cst_6 : f32 to vector<1x16xf32>
    %10 = vector.extract_strided_slice %4 {offsets = [0, 0], sizes = [1, 16], strides = [1, 1]} : vector<1x256xf32> to vector<1x16xf32>
    %11 = arith.addf %8, %10 : vector<1x16xf32>
    %12 = vector.extract_strided_slice %7 {offsets = [0, 0], sizes = [1, 16], strides = [1, 1]} : vector<1x256xf32> to vector<1x16xf32>
    %13 = arith.addf %9, %12 : vector<1x16xf32>
    %14 = vector.extract_strided_slice %4 {offsets = [0, 16], sizes = [1, 16], strides = [1, 1]} : vector<1x256xf32> to vector<1x16xf32>
    %15 = arith.addf %11, %14 : vector<1x16xf32>
    %16 = vector.extract_strided_slice %7 {offsets = [0, 16], sizes = [1, 16], strides = [1, 1]} : vector<1x256xf32> to vector<1x16xf32>
    %17 = arith.addf %13, %16 : vector<1x16xf32>
    %18 = vector.extract_strided_slice %4 {offsets = [0, 32], sizes = [1, 16], strides = [1, 1]} : vector<1x256xf32> to vector<1x16xf32>
    %19 = arith.addf %15, %18 : vector<1x16xf32>
    %20 = vector.extract_strided_slice %7 {offsets = [0, 32], sizes = [1, 16], strides = [1, 1]} : vector<1x256xf32> to vector<1x16xf32>
    %21 = arith.addf %17, %20 : vector<1x16xf32>
    %22 = vector.extract_strided_slice %4 {offsets = [0, 48], sizes = [1, 16], strides = [1, 1]} : vector<1x256xf32> to vector<1x16xf32>
    %23 = arith.addf %19, %22 : vector<1x16xf32>
    %24 = vector.extract_strided_slice %7 {offsets = [0, 48], sizes = [1, 16], strides = [1, 1]} : vector<1x256xf32> to vector<1x16xf32>
    %25 = arith.addf %21, %24 : vector<1x16xf32>
    %26 = vector.extract_strided_slice %4 {offsets = [0, 64], sizes = [1, 16], strides = [1, 1]} : vector<1x256xf32> to vector<1x16xf32>
    %27 = arith.addf %23, %26 : vector<1x16xf32>
    %28 = vector.extract_strided_slice %7 {offsets = [0, 64], sizes = [1, 16], strides = [1, 1]} : vector<1x256xf32> to vector<1x16xf32>
    %29 = arith.addf %25, %28 : vector<1x16xf32>
    %30 = vector.extract_strided_slice %4 {offsets = [0, 80], sizes = [1, 16], strides = [1, 1]} : vector<1x256xf32> to vector<1x16xf32>
    %31 = arith.addf %27, %30 : vector<1x16xf32>
    %32 = vector.extract_strided_slice %7 {offsets = [0, 80], sizes = [1, 16], strides = [1, 1]} : vector<1x256xf32> to vector<1x16xf32>
    %33 = arith.addf %29, %32 : vector<1x16xf32>
    %34 = vector.extract_strided_slice %4 {offsets = [0, 96], sizes = [1, 16], strides = [1, 1]} : vector<1x256xf32> to vector<1x16xf32>
    %35 = arith.addf %31, %34 : vector<1x16xf32>
    %36 = vector.extract_strided_slice %7 {offsets = [0, 96], sizes = [1, 16], strides = [1, 1]} : vector<1x256xf32> to vector<1x16xf32>
    %37 = arith.addf %33, %36 : vector<1x16xf32>
    %38 = vector.extract_strided_slice %4 {offsets = [0, 112], sizes = [1, 16], strides = [1, 1]} : vector<1x256xf32> to vector<1x16xf32>
    %39 = arith.addf %35, %38 : vector<1x16xf32>
    %40 = vector.extract_strided_slice %7 {offsets = [0, 112], sizes = [1, 16], strides = [1, 1]} : vector<1x256xf32> to vector<1x16xf32>
    %41 = arith.addf %37, %40 : vector<1x16xf32>
    %42 = vector.extract_strided_slice %4 {offsets = [0, 128], sizes = [1, 16], strides = [1, 1]} : vector<1x256xf32> to vector<1x16xf32>
    %43 = arith.addf %39, %42 : vector<1x16xf32>
    %44 = vector.extract_strided_slice %7 {offsets = [0, 128], sizes = [1, 16], strides = [1, 1]} : vector<1x256xf32> to vector<1x16xf32>
    %45 = arith.addf %41, %44 : vector<1x16xf32>
    %46 = vector.extract_strided_slice %4 {offsets = [0, 144], sizes = [1, 16], strides = [1, 1]} : vector<1x256xf32> to vector<1x16xf32>
    %47 = arith.addf %43, %46 : vector<1x16xf32>
    %48 = vector.extract_strided_slice %7 {offsets = [0, 144], sizes = [1, 16], strides = [1, 1]} : vector<1x256xf32> to vector<1x16xf32>
    %49 = arith.addf %45, %48 : vector<1x16xf32>
    %50 = vector.extract_strided_slice %4 {offsets = [0, 160], sizes = [1, 16], strides = [1, 1]} : vector<1x256xf32> to vector<1x16xf32>
    %51 = arith.addf %47, %50 : vector<1x16xf32>
    %52 = vector.extract_strided_slice %7 {offsets = [0, 160], sizes = [1, 16], strides = [1, 1]} : vector<1x256xf32> to vector<1x16xf32>
    %53 = arith.addf %49, %52 : vector<1x16xf32>
    %54 = vector.extract_strided_slice %4 {offsets = [0, 176], sizes = [1, 16], strides = [1, 1]} : vector<1x256xf32> to vector<1x16xf32>
    %55 = arith.addf %51, %54 : vector<1x16xf32>
    %56 = vector.extract_strided_slice %7 {offsets = [0, 176], sizes = [1, 16], strides = [1, 1]} : vector<1x256xf32> to vector<1x16xf32>
    %57 = arith.addf %53, %56 : vector<1x16xf32>
    %58 = vector.extract_strided_slice %4 {offsets = [0, 192], sizes = [1, 16], strides = [1, 1]} : vector<1x256xf32> to vector<1x16xf32>
    %59 = arith.addf %55, %58 : vector<1x16xf32>
    %60 = vector.extract_strided_slice %7 {offsets = [0, 192], sizes = [1, 16], strides = [1, 1]} : vector<1x256xf32> to vector<1x16xf32>
    %61 = arith.addf %57, %60 : vector<1x16xf32>
    %62 = vector.extract_strided_slice %4 {offsets = [0, 208], sizes = [1, 16], strides = [1, 1]} : vector<1x256xf32> to vector<1x16xf32>
    %63 = arith.addf %59, %62 : vector<1x16xf32>
    %64 = vector.extract_strided_slice %7 {offsets = [0, 208], sizes = [1, 16], strides = [1, 1]} : vector<1x256xf32> to vector<1x16xf32>
    %65 = arith.addf %61, %64 : vector<1x16xf32>
    %66 = vector.extract_strided_slice %4 {offsets = [0, 224], sizes = [1, 16], strides = [1, 1]} : vector<1x256xf32> to vector<1x16xf32>
    %67 = arith.addf %63, %66 : vector<1x16xf32>
    %68 = vector.extract_strided_slice %7 {offsets = [0, 224], sizes = [1, 16], strides = [1, 1]} : vector<1x256xf32> to vector<1x16xf32>
    %69 = arith.addf %65, %68 : vector<1x16xf32>
    %70 = vector.extract_strided_slice %4 {offsets = [0, 240], sizes = [1, 16], strides = [1, 1]} : vector<1x256xf32> to vector<1x16xf32>
    %71 = arith.addf %67, %70 : vector<1x16xf32>
    %72 = vector.extract_strided_slice %7 {offsets = [0, 240], sizes = [1, 16], strides = [1, 1]} : vector<1x256xf32> to vector<1x16xf32>
    %73 = arith.addf %69, %72 : vector<1x16xf32>
    %cst_7 = arith.constant 3.125000e-02 : f32
    %74 = vector.broadcast %cst_7 : f32 to vector<1x16xf32>
    %75 = arith.mulf %71, %74 : vector<1x16xf32>
    %cst_8 = arith.constant 3.125000e-02 : f32
    %76 = vector.broadcast %cst_8 : f32 to vector<1x16xf32>
    %77 = arith.mulf %73, %76 : vector<1x16xf32>
    %78 = arith.mulf %75, %75 : vector<1x16xf32>
    %79 = arith.subf %77, %78 : vector<1x16xf32>
    %cst_9 = arith.constant 0.000000e+00 : f32
    %80 = vector.broadcast %cst_9 : f32 to vector<1x16xf32>
    %81 = arith.maximumf %79, %80 : vector<1x16xf32>
    %cst_10 = arith.constant 9.99999974E-6 : f32
    %82 = vector.broadcast %cst_10 : f32 to vector<1x16xf32>
    %83 = arith.addf %81, %82 : vector<1x16xf32>
    %84 = math.rsqrt %83 : vector<1x16xf32>
    %c0_11 = arith.constant 0 : index
    %c0_12 = arith.constant 0 : index
    %85 = vector.load %arg2[%c0_11, %c0_12] : memref<1x16xf32, #tpu.memory_space<vmem>>, vector<1x16xf32>
    %86 = arith.mulf %85, %84 : vector<1x16xf32>
    %c0_13 = arith.constant 0 : index
    %c0_14 = arith.constant 0 : index
    %87 = vector.load %arg3[%c0_13, %c0_14] : memref<1x16xf32, #tpu.memory_space<vmem>>, vector<1x16xf32>
    %88 = arith.mulf %75, %86 : vector<1x16xf32>
    %89 = arith.subf %87, %88 : vector<1x16xf32>
    %90 = tpu.concatenate %86, %86, %86, %86, %86, %86, %86, %86, %86, %86, %86, %86, %86, %86, %86, %86 in 1 : vector<1x16xf32>, vector<1x16xf32>, vector<1x16xf32>, vector<1x16xf32>, vector<1x16xf32>, vector<1x16xf32>, vector<1x16xf32>, vector<1x16xf32>, vector<1x16xf32>, vector<1x16xf32>, vector<1x16xf32>, vector<1x16xf32>, vector<1x16xf32>, vector<1x16xf32>, vector<1x16xf32>, vector<1x16xf32> -> vector<1x256xf32>
    %91 = tpu.concatenate %89, %89, %89, %89, %89, %89, %89, %89, %89, %89, %89, %89, %89, %89, %89, %89 in 1 : vector<1x16xf32>, vector<1x16xf32>, vector<1x16xf32>, vector<1x16xf32>, vector<1x16xf32>, vector<1x16xf32>, vector<1x16xf32>, vector<1x16xf32>, vector<1x16xf32>, vector<1x16xf32>, vector<1x16xf32>, vector<1x16xf32>, vector<1x16xf32>, vector<1x16xf32>, vector<1x16xf32>, vector<1x16xf32> -> vector<1x256xf32>
    %92 = vector.broadcast %90 : vector<1x256xf32> to vector<2x256xf32>
    %93 = arith.mulf %2, %92 : vector<2x256xf32>
    %94 = vector.broadcast %91 : vector<1x256xf32> to vector<2x256xf32>
    %95 = arith.addf %93, %94 : vector<2x256xf32>
    %cst_15 = arith.constant 0.000000e+00 : f32
    %96 = vector.broadcast %cst_15 : f32 to vector<2x256xf32>
    %97 = arith.maximumf %95, %96 : vector<2x256xf32>
    %c0_16 = arith.constant 0 : index
    %c0_17 = arith.constant 0 : index
    %98 = vector.load %arg4[%c0_16, %c0_17] : memref<2x256xf32, #tpu.memory_space<vmem>>, vector<2x256xf32>
    tpu.vector_store %arg4[%c0_16, %c0_17], %97 {strides = array<i32>} : memref<2x256xf32, #tpu.memory_space<vmem>>, vector<2x256xf32>,
    return
  }
}

</mosaic_0001>

<bundles_post_ra>
// kernel: tpu_custom_call.1
= control target key start
LH: loop header
LB: loop body
LE: loop exit
PB: predicated region body
PF: predicated region fallthrough
CT: control target
= control target key end

     0   :  { %9 = vsyncpa [#allocation3], 0  ;;  %s610_s0 = inlined_call_operand.hbm [shape: f32[2,8], index: 0, kind: input, shape index: {}]   ;;  %s611_s1 = inlined_call_operand.hbm [shape: f32[8,256], index: 1, kind: input, shape index: {}]   ;;  %s612_s2 = inlined_call_operand.vmem [shape: f32[1,16], index: 2, kind: input, shape index: {}]   ;;  %s613_s3 = inlined_call_operand.vmem [shape: f32[1,16], index: 3, kind: input, shape index: {}]   ;;  %s614_s4 = inlined_call_operand.hbm [shape: f32[2,256], index: 4, kind: output, shape index: {}]  }
   0x1   :  { %10 = vsyncpa [#allocation6], 0 }
   0x2   :  { %11 = vsyncpa [#allocation4], 0  ;;  %s479_s15 = smov [#allocation2]   ;;  %s480_s17 = smov [#allocation5]  }
   0x3   :  { %s18_s16 = sshll.u32 %s479_s15, 4  ;;  %s28_s18 = sshll.u32 %s480_s17, 4  ;;  %s19_s16 = int_to_ptr.vmem [resolvable:$true] %s18_s16  ;;  %s29_s18 = int_to_ptr.vmem [resolvable:$true] %s28_s18 }
   0x4   :  { %s421_s19 = scalar_lea.vmem %s19_s16, 32  ;;  %p426_p1 = scmp.lt.s32.totalorder %s19_s16, %s19_s16 }
   0x5   :  { %p422_p0 = scmp.ne.s32.totalorder %s19_s16, %s421_s19  ;;  %p427_p2 = scmp.lt.s32.totalorder %s421_s19, %s421_s19 }
   0x7   :  { %p428_p3 = por %p427_p2, %p426_p1 }
   0x9   :  { %p429_p4 = pnand %p428_p3, %p422_p0 }
   0xb   :  { %432 = shalt.err (!%p429_p4)
}
   0xc   :  { %21 = dma.hbm_to_vmem [thread:$0]  %s610_s0, 32, %s19_s16, [#allocation3]  }
   0xd   :  { %s441_s22 = scalar_lea.vmem %s29_s18, 256  ;;  %p446_p6 = scmp.lt.s32.totalorder %s29_s18, %s29_s18 }
   0xe   :  { %p442_p5 = scmp.ne.s32.totalorder %s29_s18, %s441_s22  ;;  %p447_p7 = scmp.lt.s32.totalorder %s441_s22, %s441_s22 }
  0x10   :  { %p448_p8 = por %p447_p7, %p446_p6 }
  0x12   :  { %p449_p9 = pnand %p448_p8, %p442_p5 }
  0x14   :  { %452 = shalt.err (!%p449_p9)
}
  0x15   :  { %31 = dma.hbm_to_vmem [thread:$0]  %s611_s1, 256, %s29_s18, [#allocation6]  }
  0x16   :  { %473 = dma.done.wait [#allocation3], 32  }
  0x17   :  { %474 = vsyncadd [#allocation3], 4294967264 }
  0x18   :  { %475 = dma.done.wait [#allocation6], 256  }
  0x19   :  { %476 = vsyncadd [#allocation6], 4294967040  ;;  %v481_v0 = vmov 0.0   ;;  %v44_v1 = vld [vmem:[#allocation5 + $0x8] sm:$0xff]  ;;  %v43_v2 = vld [vmem:[#allocation5] sm:$0xff]  ;;  %vm45_vm0 = vcmask 64512  }
  0x1a   :  { %113 = vmatprep.mubr.f32.mxu0 %v481_v0  ;;  %v42_v3 = vld [vmem:[#allocation2] sm:$0x3]  ;;  %79 = vmatprep.subr.mxu0 %v44_v1  ;;  %vm120_vm1 = vcmask 1041408   ;;  %s482_s0 = smov 96   ;;  %s483_s1 = smov 112   ;;  %vm309_vm2 = vcmask 130048  }
  0x1b   :  { %80 = vmatpush1.msra.mxu0 %v43_v2  ;;  %s484_s25 = smov 80   ;;  %s485_s26 = smov 64   ;;  %vm311_vm3 = vcmask 261120   ;;  %vm313_vm4 = vcmask 392192   ;;  %vm315_vm5 = vcmask 523264   ;;  %vm317_vm6 = vcmask 654336  }
  0x1c   :  { %398 = vmatmul.mubr.msk.f32.vlgmr.msra.gmra.mxu0 %vm45_vm0, %v42_v3  ;;  %s486_s27 = smov 48   ;;  %s487_s28 = smov 32   ;;  %vm319_vm7 = vcmask 785408   ;;  %vm321_vm8 = vcmask 916480  }
  0x1d   :  { %s488_s29 = smov 16  }
  0xdc   :  { %v521_v4 = vpop.f32.mrf.mxu0 }
  0xdd   :  { %v121_v5 = vsel %vm120_vm1, %v521_v4, 0.0  ;;  %v135_v6 = vmul.f32 %v521_v4, %v521_v4 }
  0xde   :  { %v122_v7 = vrot.slane %v121_v5, 4  ;;  %v528_v17 = vpop.f32.mrf.mxu0 }
  0xdf   :  { %v137_v8 = vsel %vm120_vm1, %v135_v6, 0.0  ;;  %v136_v20 = vmul.f32 %v528_v17, %v528_v17  ;;  %v128_v22 = vsel %vm120_vm1, %v528_v17, 0.0 }
  0xe0   :  { %v123_v9 = vadd.f32 %v122_v7, %v121_v5  ;;  %v138_v10 = vrot.slane %v137_v8, 4  ;;  %v129_v24 = vrot.slane %v128_v22, 4 }
  0xe1   :  { %v144_v23 = vsel %vm120_vm1, %v136_v20, 0.0 }
  0xe2   :  { %v124_v11 = vrot.slane %v123_v9, 2  ;;  %v139_v12 = vadd.f32 %v138_v10, %v137_v8  ;;  %v145_v25 = vrot.slane %v144_v23, 4  ;;  %v130_v26 = vadd.f32 %v129_v24, %v128_v22 }
  0xe4   :  { %v125_v13 = vadd.f32 %v124_v11, %v123_v9  ;;  %v140_v14 = vrot.slane %v139_v12, 2  ;;  %v146_v27 = vadd.f32 %v145_v25, %v144_v23  ;;  %v131_v28 = vrot.slane %v130_v26, 2 }
  0xe6   :  { %v126_v15 = vrot.slane %v125_v13, 1  ;;  %v141_v16 = vadd.f32 %v140_v14, %v139_v12  ;;  %v147_v29 = vrot.slane %v146_v27, 2  ;;  %v132_v30 = vadd.f32 %v131_v28, %v130_v26 }
  0xe8   :  { %v530_v18 = vadd.f32 %v126_v15, %v125_v13  ;;  %v142_v19 = vrot.slane %v141_v16, 1  ;;  %v148_v31 = vadd.f32 %v147_v29, %v146_v27  ;;  %v133_v32 = vrot.slane %v132_v30, 1 }
  0xea   :  { %163 = vrot.lane.b32.xlu1 %v530_v18, %s482_s0  ;;  %154 = vrot.lane.b32.xlu0 %v530_v18, %s483_s1  ;;  %v143_v21 = vadd.f32 %v142_v19, %v141_v16  ;;  %v149_v33 = vrot.slane %v148_v31, 1  ;;  %v134_v34 = vadd.f32 %v133_v32, %v132_v30 }
  0xec   :  { %v150_v35 = vadd.f32 %v149_v33, %v148_v31 }
  0xee   :  { %167 = vrot.lane.b32.xlu1 %v143_v21, %s482_s0  ;;  %171 = vrot.lane.b32.xlu0 %v530_v18, %s484_s25 }
  0xf2   :  { %175 = vrot.lane.b32.xlu1 %v143_v21, %s484_s25  ;;  %179 = vrot.lane.b32.xlu0 %v530_v18, %s485_s26 }
  0xf6   :  { %183 = vrot.lane.b32.xlu1 %v143_v21, %s485_s26  ;;  %187 = vrot.lane.b32.xlu0 %v530_v18, %s486_s27 }
  0xfa   :  { %191 = vrot.lane.b32.xlu1 %v143_v21, %s486_s27  ;;  %195 = vrot.lane.b32.xlu0 %v530_v18, %s487_s28 }
  0xfe   :  { %199 = vrot.lane.b32.xlu1 %v143_v21, %s487_s28  ;;  %203 = vrot.lane.b32.xlu0 %v530_v18, %s488_s29 }
 0x102   :  { %207 = vrot.lane.b32.xlu1 %v143_v21, %s488_s29  ;;  %159 = vrot.lane.b32.xlu0 %v143_v21, %s483_s1 }
 0x106   :  { %219 = vrot.lane.b32.xlu1 %v150_v35, %s483_s1  ;;  %214 = vrot.lane.b32.xlu0 %v134_v34, %s483_s1 }
 0x10a   :  { %227 = vrot.lane.b32.xlu1 %v150_v35, %s482_s0  ;;  %223 = vrot.lane.b32.xlu0 %v134_v34, %s482_s0 }
 0x10e   :  { %235 = vrot.lane.b32.xlu1 %v150_v35, %s484_s25  ;;  %231 = vrot.lane.b32.xlu0 %v134_v34, %s484_s25 }
 0x112   :  { %243 = vrot.lane.b32.xlu1 %v150_v35, %s485_s26  ;;  %239 = vrot.lane.b32.xlu0 %v134_v34, %s485_s26 }
 0x116   :  { %251 = vrot.lane.b32.xlu1 %v150_v35, %s486_s27  ;;  %247 = vrot.lane.b32.xlu0 %v134_v34, %s486_s27 }
 0x11a   :  { %259 = vrot.lane.b32.xlu1 %v150_v35, %s487_s28  ;;  %255 = vrot.lane.b32.xlu0 %v134_v34, %s487_s28 }
 0x11e   :  { %267 = vrot.lane.b32.xlu1 %v150_v35, %s488_s29  ;;  %263 = vrot.lane.b32.xlu0 %v134_v34, %s488_s29 }
 0x15c   :  { %v164_v36 = vpop.permute.xlu1 %163  ;;  %v155_v37 = vpop.permute.xlu0 %154 }
 0x15d   :  { %v157_v46 = vadd.f32 %v155_v37, %v530_v18 }
 0x15f   :  { %v166_v49 = vadd.f32 %v164_v36, %v157_v46 }
 0x160   :  { %v168_v38 = vpop.permute.xlu1 %167  ;;  %v172_v39 = vpop.permute.xlu0 %171 }
 0x161   :  { %v174_v53 = vadd.f32 %v172_v39, %v166_v49 }
 0x164   :  { %v176_v40 = vpop.permute.xlu1 %175  ;;  %v180_v41 = vpop.permute.xlu0 %179 }
 0x165   :  { %v182_v57 = vadd.f32 %v180_v41, %v174_v53 }
 0x168   :  { %v184_v42 = vpop.permute.xlu1 %183  ;;  %v188_v43 = vpop.permute.xlu0 %187 }
 0x169   :  { %v190_v59 = vadd.f32 %v188_v43, %v182_v57 }
 0x16c   :  { %v192_v44 = vpop.permute.xlu1 %191  ;;  %v196_v45 = vpop.permute.xlu0 %195 }
 0x16d   :  { %v198_v63 = vadd.f32 %v196_v45, %v190_v59 }
 0x170   :  { %v200_v47 = vpop.permute.xlu1 %199  ;;  %v204_v48 = vpop.permute.xlu0 %203 }
 0x171   :  { %v206_v1 = vadd.f32 %v204_v48, %v198_v63 }
 0x173   :  { %v211_v8 = vadd.f32 %v206_v1, %v134_v34 }
 0x174   :  { %v208_v50 = vpop.permute.xlu1 %207  ;;  %v160_v51 = vpop.permute.xlu0 %159 }
 0x175   :  { %v162_v52 = vadd.f32 %v160_v51, %v143_v21 }
 0x177   :  { %v170_v54 = vadd.f32 %v168_v38, %v162_v52  ;;  %v284_v38 = vlaneseq }
 0x178   :  { %v220_v55 = vpop.permute.xlu1 %219  ;;  %v215_v56 = vpop.permute.xlu0 %214 }
 0x179   :  { %v178_v58 = vadd.f32 %v176_v40, %v170_v54  ;;  %v217_v12 = vadd.f32 %v215_v56, %v211_v8  ;;  %v285_v39 = vshrl.u32 %v284_v38, 7  ;;  %v278_v40 = vld [vmem:[%s612_s2] sm:$0x1]  ;;  %s489_s2 = smov [#allocation7]  }
 0x17b   :  { %v186_v60 = vadd.f32 %v184_v42, %v178_v58  ;;  %v286_v41 = vsub.s32 0, %v285_v39 }
 0x17c   :  { %v228_v61 = vpop.permute.xlu1 %227  ;;  %v224_v62 = vpop.permute.xlu0 %223 }
 0x17d   :  { %v194_v0 = vadd.f32 %v192_v44, %v186_v60  ;;  %v226_v14 = vadd.f32 %v224_v62, %v217_v12  ;;  %v280_v44 = vld [vmem:[%s613_s3] sm:$0x1]  ;;  %s388_s3 = sshll.u32 %s489_s2, 4  ;;  %s389_s3 = int_to_ptr.vmem [resolvable:$true] %s388_s3 }
 0x17e   :  { %s453_s8 = scalar_lea.vmem %s389_s3, 64  ;;  %p458_p11 = scmp.lt.s32.totalorder %s389_s3, %s389_s3 }
 0x17f   :  { %v202_v2 = vadd.f32 %v200_v47, %v194_v0  ;;  %p454_p10 = scmp.ne.s32.totalorder %s389_s3, %s453_s8  ;;  %p459_p12 = scmp.lt.s32.totalorder %s453_s8, %s453_s8 }
 0x180   :  { %v236_v3 = vpop.permute.xlu1 %235  ;;  %v232_v5 = vpop.permute.xlu0 %231 }
 0x181   :  { %v210_v6 = vadd.f32 %v208_v50, %v202_v2  ;;  %v234_v19 = vadd.f32 %v232_v5, %v226_v14  ;;  %p460_p13 = por %p459_p12, %p458_p11 }
 0x183   :  { %v212_v7 = vadd.f32 %v210_v6, %v150_v35  ;;  %p461_p0 = pnand %p460_p13, %p454_p10 }
 0x184   :  { %v244_v9 = vpop.permute.xlu1 %243  ;;  %v240_v10 = vpop.permute.xlu0 %239 }
 0x185   :  { %v222_v11 = vadd.f32 %v220_v55, %v212_v7  ;;  %v242_v21 = vadd.f32 %v240_v10, %v234_v19 }
 0x187   :  { %v230_v13 = vadd.f32 %v228_v61, %v222_v11 }
 0x188   :  { %v252_v15 = vpop.permute.xlu1 %251  ;;  %v248_v16 = vpop.permute.xlu0 %247 }
 0x189   :  { %v238_v18 = vadd.f32 %v236_v3, %v230_v13  ;;  %v250_v25 = vadd.f32 %v248_v16, %v242_v21 }
 0x18b   :  { %v246_v20 = vadd.f32 %v244_v9, %v238_v18 }
 0x18c   :  { %v260_v22 = vpop.permute.xlu1 %259  ;;  %v256_v23 = vpop.permute.xlu0 %255 }
 0x18d   :  { %v254_v24 = vadd.f32 %v252_v15, %v246_v20  ;;  %v258_v27 = vadd.f32 %v256_v23, %v250_v25 }
 0x18f   :  { %v262_v26 = vadd.f32 %v260_v22, %v254_v24 }
 0x190   :  { %v268_v28 = vpop.permute.xlu1 %267  ;;  %v264_v29 = vpop.permute.xlu0 %263 }
 0x191   :  { %v270_v30 = vadd.f32 %v268_v28, %v262_v26  ;;  %v266_v31 = vadd.f32 %v264_v29, %v258_v27 }
 0x193   :  { %v271_v32 = vmul.f32 0.03125, %v266_v31  ;;  %v272_v33 = vmul.f32 0.03125, %v270_v30 }
 0x195   :  { %v273_v34 = vmul.f32 %v271_v32, %v271_v32 }
 0x197   :  { %v274_v35 = vsub.f32 %v272_v33, %v273_v34 }
 0x199   :  { %v275_v36 = vmax.f32 %v274_v35, 0.0 }
 0x19b   :  { %v276_v37 = vadd.f32 1e-05, %v275_v36 }
 0x19d   :  { %411 = vrsqrt.f32 %v276_v37 }
 0x1aa   :  { %v412_v42 = vpop.eup %411 }
 0x1ab   :  { %v279_v43 = vmul.f32 %v412_v42, %v278_v40 }
 0x1ad   :  { %v281_v45 = vmul.f32 %v279_v43, %v271_v32  ;;  %v287_v46 = vrot.slane %v279_v43, %v286_v41 }
 0x1af   :  { %v282_v47 = vsub.f32 %v280_v44, %v281_v45  ;;  %291 = vrot.lane.b32.xlu1 %v287_v46, %s487_s28  ;;  %288 = vrot.lane.b32.xlu0 %v287_v46, %s488_s29 }
 0x1b1   :  { %v327_v48 = vrot.slane %v282_v47, %v286_v41 }
 0x1b3   :  { %294 = vrot.lane.b32.xlu0 %v287_v46, %s486_s27  ;;  %328 = vrot.lane.b32.xlu1 %v327_v48, %s488_s29 }
 0x1b7   :  { %297 = vrot.lane.b32.xlu0 %v287_v46, %s485_s26  ;;  %331 = vrot.lane.b32.xlu1 %v327_v48, %s487_s28 }
 0x1bb   :  { %300 = vrot.lane.b32.xlu0 %v287_v46, %s484_s25  ;;  %334 = vrot.lane.b32.xlu1 %v327_v48, %s486_s27 }
 0x1bf   :  { %303 = vrot.lane.b32.xlu0 %v287_v46, %s482_s0  ;;  %337 = vrot.lane.b32.xlu1 %v327_v48, %s485_s26 }
 0x1c3   :  { %306 = vrot.lane.b32.xlu0 %v287_v46, %s483_s1  ;;  %340 = vrot.lane.b32.xlu1 %v327_v48, %s484_s25 }
 0x1c7   :  { %343 = vrot.lane.b32.xlu0 %v327_v48, %s482_s0  ;;  %346 = vrot.lane.b32.xlu1 %v327_v48, %s483_s1 }
 0x221   :  { %v292_v49 = vpop.permute.xlu1 %291  ;;  %v289_v50 = vpop.permute.xlu0 %288 }
 0x222   :  { %v310_v57 = vsel %vm309_vm2, %v279_v43, %v289_v50 }
 0x223   :  { %v312_v58 = vsel %vm311_vm3, %v310_v57, %v292_v49 }
 0x225   :  { %v295_v51 = vpop.permute.xlu0 %294  ;;  %v329_v52 = vpop.permute.xlu1 %328 }
 0x226   :  { %v314_v61 = vsel %vm313_vm4, %v312_v58, %v295_v51  ;;  %v349_v0 = vsel %vm309_vm2, %v282_v47, %v329_v52 }
 0x229   :  { %v298_v53 = vpop.permute.xlu0 %297  ;;  %v332_v54 = vpop.permute.xlu1 %331 }
 0x22a   :  { %v316_v62 = vsel %vm315_vm5, %v314_v61, %v298_v53  ;;  %v350_v5 = vsel %vm311_vm3, %v349_v0, %v332_v54 }
 0x22d   :  { %v301_v55 = vpop.permute.xlu0 %300  ;;  %v335_v56 = vpop.permute.xlu1 %334 }
 0x22e   :  { %v318_v63 = vsel %vm317_vm6, %v316_v62, %v301_v55  ;;  %v351_v7 = vsel %vm313_vm4, %v350_v5, %v335_v56 }
 0x231   :  { %v304_v59 = vpop.permute.xlu0 %303  ;;  %v338_v60 = vpop.permute.xlu1 %337 }
 0x232   :  { %v320_v1 = vsel %vm319_vm7, %v318_v63, %v304_v59  ;;  %v352_v8 = vsel %vm315_vm5, %v351_v7, %v338_v60 }
 0x235   :  { %v307_v2 = vpop.permute.xlu0 %306  ;;  %v341_v3 = vpop.permute.xlu1 %340 }
 0x236   :  { %v322_v6 = vsel %vm321_vm8, %v320_v1, %v307_v2  ;;  %v353_v10 = vsel %vm317_vm6, %v352_v8, %v341_v3 }
 0x237   :  { %v359_v9 = vrot.slane %v322_v6, %v286_v41 }
 0x239   :  { %v344_v11 = vpop.permute.xlu0 %343  ;;  %v347_v12 = vpop.permute.xlu1 %346  ;;  %v360_v15 = vmul.f32 %v359_v9, %v521_v4  ;;  %v361_v16 = vmul.f32 %v359_v9, %v528_v17 }
 0x23a   :  { %v354_v13 = vsel %vm319_vm7, %v353_v10, %v344_v11 }
 0x23b   :  { %v355_v14 = vsel %vm321_vm8, %v354_v13, %v347_v12 }
 0x23c   :  { %v365_v18 = vrot.slane %v355_v14, %v286_v41 }
 0x23e   :  { %v366_v19 = vadd.f32 %v365_v18, %v360_v15  ;;  %v367_v20 = vadd.f32 %v365_v18, %v361_v16 }
 0x240   :  { %v368_v21 = vmax.f32 %v366_v19, 0.0  ;;  %v369_v22 = vmax.f32 %v367_v20, 0.0 }
 0x242   :  { %v372_v23 = vcombine.low %v368_v21, %v369_v22 }
 0x244   :  { %399 = vst.sshfl [vmem:[#allocation7] sm:$0x33 pattern:$0x76325410] %v372_v23 }
 0x245   :  { %464 = shalt.err (!%p461_p0)
}
 0x246   :  { %391 = dma.vmem_to_hbm [thread:$0]  %s389_s3, 64, %s614_s4, [#allocation4]  }
 0x247   :  { %477 = dma.done.wait [#allocation4], 64  }
 0x248   :  { %478 = vsyncadd [#allocation4], 4294967232 }
 0x249   :  { %395 = vsyncpa [#allocation3], 1 }
 0x24a   :  { %396 = vsyncpa [#allocation6], 1 }
 0x24b   :  { %397 = vsyncpa [#allocation4], 1 }

</bundles_post_ra>
